<compile_context>
chip_gen: v7x
topology: tpu7x:2x2x1
jax: 0.10.0
libtpu: 0.0.40
codegen_flags: <defaults>
</compile_context>

<pallas_src>
import jax
import jax.numpy as jnp
from jax.experimental import pallas as pl
from jax.experimental.pallas import tpu as pltpu

KSIZE = 3  # every Conv1d layer: kernel_size=3, stride=1, valid padding


def _f0_fused_kernel(x_ref, w1_ref, w23_ref, bias_ref, o_ref, s1_ref, s2_ref):
    """Fused 3x (Conv1d k=3 'valid' + ReLU), fully VMEM resident.

    Layout: time on sublanes, channels on lanes.  Batch is stacked along the
    time axis; rows whose conv window straddles a batch seam are garbage and
    are never read back.

    x_ref   : (B*L, 1)       input signal, batch-stacked (C_in = 1)
    w1_ref  : (3, C)         layer-1 taps, w1[k, co]        = W1_torch[co, 0, k]
    w23_ref : (2, 3, C, C)   per-tap weights, w23[l, k, ci, co] = W_torch[co, ci, k]
    bias_ref: (3, C)         rows = b1, b2, b3
    o_ref   : (B, L-6, C)    final activations, channels-last
    s1_ref  : (B*L-2, C)     VMEM scratch: layer-1 activations (flat sequence)
    s2_ref  : (B*L-4, C)     VMEM scratch: layer-2 activations (flat sequence)
    """
    BL = x_ref.shape[0]
    B, L3, _ = o_ref.shape
    L = BL // B
    F1, F2, F3 = BL - 2, BL - 4, BL - 6   # "full-overlap" lengths per layer

    # ---- layer 1 (C_in == 1): exact-f32 VPU broadcast multiply-adds --------
    # Ref slices at sublane offsets are plain vector loads (no XLU rotates).
    acc = x_ref[pl.ds(0, F1), :] * w1_ref[pl.ds(0, 1), :]
    acc += x_ref[pl.ds(1, F1), :] * w1_ref[pl.ds(1, 1), :]
    acc += x_ref[pl.ds(2, F1), :] * w1_ref[pl.ds(2, 1), :]
    s1_ref[...] = jnp.maximum(acc + bias_ref[pl.ds(0, 1), :], 0.0)

    # ---- layer 2: 3 per-tap accumulating MXU dots over the stacked batch ---
    acc = jnp.dot(s1_ref[pl.ds(0, F2), :], w23_ref[0, 0],
                  preferred_element_type=jnp.float32)
    acc += jnp.dot(s1_ref[pl.ds(1, F2), :], w23_ref[0, 1],
                   preferred_element_type=jnp.float32)
    acc += jnp.dot(s1_ref[pl.ds(2, F2), :], w23_ref[0, 2],
                   preferred_element_type=jnp.float32)
    s2_ref[...] = jnp.maximum(acc + bias_ref[pl.ds(1, 1), :], 0.0)

    # ---- layer 3: same, then copy each batch's valid rows to the output ----
    acc = jnp.dot(s2_ref[pl.ds(0, F3), :], w23_ref[1, 0],
                  preferred_element_type=jnp.float32)
    acc += jnp.dot(s2_ref[pl.ds(1, F3), :], w23_ref[1, 1],
                   preferred_element_type=jnp.float32)
    acc += jnp.dot(s2_ref[pl.ds(2, F3), :], w23_ref[1, 2],
                   preferred_element_type=jnp.float32)
    h3 = jnp.maximum(acc + bias_ref[pl.ds(2, 1), :], 0.0)   # (F3, C)

    # Valid rows for batch b start at b*L (multiple of 8 -> vreg-aligned slice).
    for b in range(B):
        o_ref[b] = h3[b * L:b * L + L3, :]


def prepare_params(params):
    """One-time conversion from PyTorch Conv1d layout (w:(Cout,Cin,K), b:(Cout,))
    to the kernel's packed layouts (hoisted out of the forward path)."""
    (w1, b1), (w2, b2), (w3, b3) = params
    w1_k = jnp.transpose(w1[:, 0, :], (1, 0))                    # (K, C)
    w23 = jnp.stack([jnp.transpose(w2, (2, 1, 0)),               # (2, K, C, C)
                     jnp.transpose(w3, (2, 1, 0))], axis=0)      # [l,k,ci,co]
    bias = jnp.stack([b1, b2, b3], axis=0)                       # (3, C)
    return w1_k, w23, bias


@jax.jit
def f0_encoder_forward(x_ncl, w1, w23, bias):
    """PyTorch-semantics forward.  x_ncl: (B, 1, L).  Returns (B, C, L-6)."""
    B, _, L = x_ncl.shape
    C = w1.shape[-1]
    L_out = L - 3 * (KSIZE - 1)

    # Pure reshape (order-preserving): (B, 1, L) -> (B*L, 1).  No transpose.
    x_flat = x_ncl.reshape(B * L, 1)

    vmem = pl.BlockSpec(memory_space=pltpu.MemorySpace.VMEM)
    out_blc = pl.pallas_call(
        _f0_fused_kernel,
        out_shape=jax.ShapeDtypeStruct((B, L_out, C), jnp.float32),
        in_specs=[vmem, vmem, vmem, vmem],
        out_specs=vmem,
        scratch_shapes=[pltpu.VMEM((B * L - 2, C), jnp.float32),
                        pltpu.VMEM((B * L - 4, C), jnp.float32)],
    )(x_flat, w1, w23, bias)

    # Single tiny transpose fused into the same jitted executable.
    return jnp.transpose(out_blc, (0, 2, 1))                     # (B, C, L_out)


def init_params(key, d_model):
    """Deterministic Conv1d params, PyTorch-style uniform(-1/sqrt(fan_in), ...)."""
    params = []
    for (c_in, c_out) in [(1, d_model), (d_model, d_model), (d_model, d_model)]:
        key, kw, kb = jax.random.split(key, 3)
        bound = 1.0 / jnp.sqrt(c_in * KSIZE)
        w = jax.random.uniform(kw, (c_out, c_in, KSIZE), jnp.float32, -bound, bound)
        b = jax.random.uniform(kb, (c_out,), jnp.float32, -bound, bound)
        params.append((w, b))
    return params


def f0_encoder_reference(x_ncl, params):
    """Pure-JAX reference (lax conv, full f32 precision) mirroring PyTorch."""
    x = x_ncl
    for (w, b) in params:
        x = jax.lax.conv_general_dilated(
            x, w, window_strides=(1,), padding="VALID",
            dimension_numbers=("NCH", "OIH", "NCH"),
            precision=jax.lax.Precision.HIGHEST,
        ) + b[None, :, None]
        x = jnp.maximum(x, 0.0)
    return x


if __name__ == "__main__":
    d_model = 32
    B, L = 2, 16

    key = jax.random.PRNGKey(0)
    key, kx = jax.random.split(key)
    x = jax.random.normal(kx, (B, 1, L), jnp.float32)   # (B, C_in=1, L) NCL

    params = init_params(key, d_model)
    w1, w23, bias = prepare_params(params)              # hoisted, done once

    out = f0_encoder_forward(x, w1, w23, bias)
    out = jax.block_until_ready(out)

    ref = f0_encoder_reference(x, params)
    assert out.shape == (B, d_model, L - 6), out.shape
    max_err = float(jnp.max(jnp.abs(out - ref)))
    assert jnp.allclose(out, ref, atol=1e-5, rtol=1e-5), max_err

    print("KERNEL_OK")
</pallas_src>

<mosaic_0001>
module attributes {stable_mosaic.version = 11 : i64} {
  func.func @_f0_fused_kernel(%arg0: memref<32x1xf32, #tpu.memory_space<vmem>>, %arg1: memref<3x32xf32, #tpu.memory_space<vmem>>, %arg2: memref<2x3x32x32xf32, #tpu.memory_space<vmem>>, %arg3: memref<3x32xf32, #tpu.memory_space<vmem>>, %arg4: memref<2x10x32xf32, #tpu.memory_space<vmem>>, %arg5: memref<30x32xf32, #tpu.memory_space<vmem>>, %arg6: memref<28x32xf32, #tpu.memory_space<vmem>>) attributes {dimension_semantics = [], scalar_prefetch = 0 : i64, scratch_operands = 2 : i64, tpu.core_type = #tpu.core_type<tc>} {
    %c0 = arith.constant 0 : index
    %c0_0 = arith.constant 0 : index
    %0 = vector.load %arg0[%c0, %c0_0] : memref<32x1xf32, #tpu.memory_space<vmem>>, vector<30x1xf32>
    %c0_1 = arith.constant 0 : index
    %c0_2 = arith.constant 0 : index
    %1 = vector.load %arg1[%c0_1, %c0_2] : memref<3x32xf32, #tpu.memory_space<vmem>>, vector<1x32xf32>
    %2 = vector.broadcast %0 : vector<30x1xf32> to vector<30x32xf32>
    %3 = vector.broadcast %1 : vector<1x32xf32> to vector<30x32xf32>
    %4 = arith.mulf %2, %3 : vector<30x32xf32>
    %c1 = arith.constant 1 : index
    %c0_3 = arith.constant 0 : index
    %5 = vector.load %arg0[%c1, %c0_3] : memref<32x1xf32, #tpu.memory_space<vmem>>, vector<30x1xf32>
    %c1_4 = arith.constant 1 : index
    %c0_5 = arith.constant 0 : index
    %6 = vector.load %arg1[%c1_4, %c0_5] : memref<3x32xf32, #tpu.memory_space<vmem>>, vector<1x32xf32>
    %7 = vector.broadcast %5 : vector<30x1xf32> to vector<30x32xf32>
    %8 = vector.broadcast %6 : vector<1x32xf32> to vector<30x32xf32>
    %9 = arith.mulf %7, %8 : vector<30x32xf32>
    %10 = arith.addf %4, %9 : vector<30x32xf32>
    %c2 = arith.constant 2 : index
    %c0_6 = arith.constant 0 : index
    %11 = vector.load %arg0[%c2, %c0_6] : memref<32x1xf32, #tpu.memory_space<vmem>>, vector<30x1xf32>
    %c2_7 = arith.constant 2 : index
    %c0_8 = arith.constant 0 : index
    %12 = vector.load %arg1[%c2_7, %c0_8] : memref<3x32xf32, #tpu.memory_space<vmem>>, vector<1x32xf32>
    %13 = vector.broadcast %11 : vector<30x1xf32> to vector<30x32xf32>
    %14 = vector.broadcast %12 : vector<1x32xf32> to vector<30x32xf32>
    %15 = arith.mulf %13, %14 : vector<30x32xf32>
    %16 = arith.addf %10, %15 : vector<30x32xf32>
    %c0_9 = arith.constant 0 : index
    %c0_10 = arith.constant 0 : index
    %17 = vector.load %arg3[%c0_9, %c0_10] : memref<3x32xf32, #tpu.memory_space<vmem>>, vector<1x32xf32>
    %18 = vector.broadcast %17 : vector<1x32xf32> to vector<30x32xf32>
    %19 = arith.addf %16, %18 : vector<30x32xf32>
    %cst = arith.constant 0.000000e+00 : f32
    %20 = vector.broadcast %cst : f32 to vector<30x32xf32>
    %21 = arith.maximumf %19, %20 : vector<30x32xf32>
    %c0_11 = arith.constant 0 : index
    %c0_12 = arith.constant 0 : index
    %22 = vector.load %arg5[%c0_11, %c0_12] : memref<30x32xf32, #tpu.memory_space<vmem>>, vector<30x32xf32>
    tpu.vector_store %arg5[%c0_11, %c0_12], %21 {strides = array<i32>} : memref<30x32xf32, #tpu.memory_space<vmem>>, vector<30x32xf32>,
    %c0_13 = arith.constant 0 : index
    %c0_14 = arith.constant 0 : index
    %23 = vector.load %arg5[%c0_13, %c0_14] : memref<30x32xf32, #tpu.memory_space<vmem>>, vector<28x32xf32>
    %c0_15 = arith.constant 0 : index
    %c0_16 = arith.constant 0 : index
    %c0_17 = arith.constant 0 : index
    %c0_18 = arith.constant 0 : index
    %24 = vector.load %arg2[%c0_15, %c0_16, %c0_17, %c0_18] : memref<2x3x32x32xf32, #tpu.memory_space<vmem>>, vector<1x1x32x32xf32>
    %25 = vector.shape_cast %24 : vector<1x1x32x32xf32> to vector<32x32xf32>
    %cst_19 = arith.constant dense<0.000000e+00> : vector<28x32xf32>
    %26 = tpu.matmul %23, %25, %cst_19 {dimension_numbers = #tpu.dot_dimension_numbers<[1], [0], [0], [1], [0, 0, 1, 1], [], []>} : vector<28x32xf32>, vector<32x32xf32>, vector<28x32xf32> -> vector<28x32xf32>
    %c1_20 = arith.constant 1 : index
    %c0_21 = arith.constant 0 : index
    %27 = vector.load %arg5[%c1_20, %c0_21] : memref<30x32xf32, #tpu.memory_space<vmem>>, vector<28x32xf32>
    %c0_22 = arith.constant 0 : index
    %c1_23 = arith.constant 1 : index
    %c0_24 = arith.constant 0 : index
    %c0_25 = arith.constant 0 : index
    %28 = vector.load %arg2[%c0_22, %c1_23, %c0_24, %c0_25] : memref<2x3x32x32xf32, #tpu.memory_space<vmem>>, vector<1x1x32x32xf32>
    %29 = vector.shape_cast %28 : vector<1x1x32x32xf32> to vector<32x32xf32>
    %cst_26 = arith.constant dense<0.000000e+00> : vector<28x32xf32>
    %30 = tpu.matmul %27, %29, %cst_26 {dimension_numbers = #tpu.dot_dimension_numbers<[1], [0], [0], [1], [0, 0, 1, 1], [], []>} : vector<28x32xf32>, vector<32x32xf32>, vector<28x32xf32> -> vector<28x32xf32>
    %31 = arith.addf %26, %30 : vector<28x32xf32>
    %c2_27 = arith.constant 2 : index
    %c0_28 = arith.constant 0 : index
    %32 = vector.load %arg5[%c2_27, %c0_28] : memref<30x32xf32, #tpu.memory_space<vmem>>, vector<28x32xf32>
    %c0_29 = arith.constant 0 : index
    %c2_30 = arith.constant 2 : index
    %c0_31 = arith.constant 0 : index
    %c0_32 = arith.constant 0 : index
    %33 = vector.load %arg2[%c0_29, %c2_30, %c0_31, %c0_32] : memref<2x3x32x32xf32, #tpu.memory_space<vmem>>, vector<1x1x32x32xf32>
    %34 = vector.shape_cast %33 : vector<1x1x32x32xf32> to vector<32x32xf32>
    %cst_33 = arith.constant dense<0.000000e+00> : vector<28x32xf32>
    %35 = tpu.matmul %32, %34, %cst_33 {dimension_numbers = #tpu.dot_dimension_numbers<[1], [0], [0], [1], [0, 0, 1, 1], [], []>} : vector<28x32xf32>, vector<32x32xf32>, vector<28x32xf32> -> vector<28x32xf32>
    %36 = arith.addf %31, %35 : vector<28x32xf32>
    %c1_34 = arith.constant 1 : index
    %c0_35 = arith.constant 0 : index
    %37 = vector.load %arg3[%c1_34, %c0_35] : memref<3x32xf32, #tpu.memory_space<vmem>>, vector<1x32xf32>
    %38 = vector.broadcast %37 : vector<1x32xf32> to vector<28x32xf32>
    %39 = arith.addf %36, %38 : vector<28x32xf32>
    %cst_36 = arith.constant 0.000000e+00 : f32
    %40 = vector.broadcast %cst_36 : f32 to vector<28x32xf32>
    %41 = arith.maximumf %39, %40 : vector<28x32xf32>
    %c0_37 = arith.constant 0 : index
    %c0_38 = arith.constant 0 : index
    %42 = vector.load %arg6[%c0_37, %c0_38] : memref<28x32xf32, #tpu.memory_space<vmem>>, vector<28x32xf32>
    tpu.vector_store %arg6[%c0_37, %c0_38], %41 {strides = array<i32>} : memref<28x32xf32, #tpu.memory_space<vmem>>, vector<28x32xf32>,
    %c0_39 = arith.constant 0 : index
    %c0_40 = arith.constant 0 : index
    %43 = vector.load %arg6[%c0_39, %c0_40] : memref<28x32xf32, #tpu.memory_space<vmem>>, vector<26x32xf32>
    %c1_41 = arith.constant 1 : index
    %c0_42 = arith.constant 0 : index
    %c0_43 = arith.constant 0 : index
    %c0_44 = arith.constant 0 : index
    %44 = vector.load %arg2[%c1_41, %c0_42, %c0_43, %c0_44] : memref<2x3x32x32xf32, #tpu.memory_space<vmem>>, vector<1x1x32x32xf32>
    %45 = vector.shape_cast %44 : vector<1x1x32x32xf32> to vector<32x32xf32>
    %cst_45 = arith.constant dense<0.000000e+00> : vector<26x32xf32>
    %46 = tpu.matmul %43, %45, %cst_45 {dimension_numbers = #tpu.dot_dimension_numbers<[1], [0], [0], [1], [0, 0, 1, 1], [], []>} : vector<26x32xf32>, vector<32x32xf32>, vector<26x32xf32> -> vector<26x32xf32>
    %c1_46 = arith.constant 1 : index
    %c0_47 = arith.constant 0 : index
    %47 = vector.load %arg6[%c1_46, %c0_47] : memref<28x32xf32, #tpu.memory_space<vmem>>, vector<26x32xf32>
    %c1_48 = arith.constant 1 : index
    %c1_49 = arith.constant 1 : index
    %c0_50 = arith.constant 0 : index
    %c0_51 = arith.constant 0 : index
    %48 = vector.load %arg2[%c1_48, %c1_49, %c0_50, %c0_51] : memref<2x3x32x32xf32, #tpu.memory_space<vmem>>, vector<1x1x32x32xf32>
    %49 = vector.shape_cast %48 : vector<1x1x32x32xf32> to vector<32x32xf32>
    %cst_52 = arith.constant dense<0.000000e+00> : vector<26x32xf32>
    %50 = tpu.matmul %47, %49, %cst_52 {dimension_numbers = #tpu.dot_dimension_numbers<[1], [0], [0], [1], [0, 0, 1, 1], [], []>} : vector<26x32xf32>, vector<32x32xf32>, vector<26x32xf32> -> vector<26x32xf32>
    %51 = arith.addf %46, %50 : vector<26x32xf32>
    %c2_53 = arith.constant 2 : index
    %c0_54 = arith.constant 0 : index
    %52 = vector.load %arg6[%c2_53, %c0_54] : memref<28x32xf32, #tpu.memory_space<vmem>>, vector<26x32xf32>
    %c1_55 = arith.constant 1 : index
    %c2_56 = arith.constant 2 : index
    %c0_57 = arith.constant 0 : index
    %c0_58 = arith.constant 0 : index
    %53 = vector.load %arg2[%c1_55, %c2_56, %c0_57, %c0_58] : memref<2x3x32x32xf32, #tpu.memory_space<vmem>>, vector<1x1x32x32xf32>
    %54 = vector.shape_cast %53 : vector<1x1x32x32xf32> to vector<32x32xf32>
    %cst_59 = arith.constant dense<0.000000e+00> : vector<26x32xf32>
    %55 = tpu.matmul %52, %54, %cst_59 {dimension_numbers = #tpu.dot_dimension_numbers<[1], [0], [0], [1], [0, 0, 1, 1], [], []>} : vector<26x32xf32>, vector<32x32xf32>, vector<26x32xf32> -> vector<26x32xf32>
    %56 = arith.addf %51, %55 : vector<26x32xf32>
    %c2_60 = arith.constant 2 : index
    %c0_61 = arith.constant 0 : index
    %57 = vector.load %arg3[%c2_60, %c0_61] : memref<3x32xf32, #tpu.memory_space<vmem>>, vector<1x32xf32>
    %58 = vector.broadcast %57 : vector<1x32xf32> to vector<26x32xf32>
    %59 = arith.addf %56, %58 : vector<26x32xf32>
    %cst_62 = arith.constant 0.000000e+00 : f32
    %60 = vector.broadcast %cst_62 : f32 to vector<26x32xf32>
    %61 = arith.maximumf %59, %60 : vector<26x32xf32>
    %62 = vector.extract_strided_slice %61 {offsets = [0, 0], sizes = [10, 32], strides = [1, 1]} : vector<26x32xf32> to vector<10x32xf32>
    %c0_63 = arith.constant 0 : index
    %c0_64 = arith.constant 0 : index
    %c0_65 = arith.constant 0 : index
    %63 = vector.load %arg4[%c0_63, %c0_64, %c0_65] : memref<2x10x32xf32, #tpu.memory_space<vmem>>, vector<1x10x32xf32>
    %64 = vector.shape_cast %63 : vector<1x10x32xf32> to vector<10x32xf32>
    %65 = vector.shape_cast %62 : vector<10x32xf32> to vector<1x10x32xf32>
    tpu.vector_store %arg4[%c0_63, %c0_64, %c0_65], %65 {strides = array<i32>} : memref<2x10x32xf32, #tpu.memory_space<vmem>>, vector<1x10x32xf32>,
    %66 = vector.extract_strided_slice %61 {offsets = [16, 0], sizes = [10, 32], strides = [1, 1]} : vector<26x32xf32> to vector<10x32xf32>
    %c1_66 = arith.constant 1 : index
    %c0_67 = arith.constant 0 : index
    %c0_68 = arith.constant 0 : index
    %67 = vector.load %arg4[%c1_66, %c0_67, %c0_68] : memref<2x10x32xf32, #tpu.memory_space<vmem>>, vector<1x10x32xf32>
    %68 = vector.shape_cast %67 : vector<1x10x32xf32> to vector<10x32xf32>
    %69 = vector.shape_cast %66 : vector<10x32xf32> to vector<1x10x32xf32>
    tpu.vector_store %arg4[%c1_66, %c0_67, %c0_68], %69 {strides = array<i32>} : memref<2x10x32xf32, #tpu.memory_space<vmem>>, vector<1x10x32xf32>,
    return
  }
}

</mosaic_0001>

<bundles_post_ra>
// kernel: f0_encoder_forward.1
= control target key start
LH: loop header
LB: loop body
LE: loop exit
PB: predicated region body
PF: predicated region fallthrough
CT: control target
= control target key end

     0   :  { %9 = vsyncpa [#allocation5], 0  ;;  %s1100_s15 = smov [#allocation4]   ;;  %s1239_s0 = inlined_call_operand.vmem [shape: f32[32,1], index: 0, kind: input, shape index: {}]   ;;  %s1240_s1 = inlined_call_operand.vmem [shape: f32[3,32], index: 1, kind: input, shape index: {}]   ;;  %s1241_s2 = inlined_call_operand.hbm [shape: f32[2,3,32,32], index: 2, kind: input, shape index: {}]   ;;  %s1242_s3 = inlined_call_operand.vmem [shape: f32[3,32], index: 3, kind: input, shape index: {}]   ;;  %s1243_s4 = inlined_call_operand.vmem [shape: f32[2,10,32], index: 4, kind: output, shape index: {}]  }
   0x1   :  { %s19_s16 = sshll.u32 %s1100_s15, 4  ;;  %s1076_s19 = scalar_lea.hbm %s1241_s2, 3072  ;;  %s20_s16 = int_to_ptr.vmem [resolvable:$true] %s19_s16 }
   0x2   :  { %p1077_p0 = scmp.ne.s32.totalorder %s1241_s2, %s1076_s19  ;;  %p1080_p1 = scmp.lt.u32.totalorder %s1076_s19, %s1241_s2 }
   0x4   :  { %p1082_p2 = pnand %p1080_p1, %p1077_p0 }
   0x6   :  { %1085 = shalt.err (!%p1082_p2)
}
   0x7   :  { %s1086_s24 = scalar_lea.vmem %s20_s16, 3072  ;;  %p1091_p4 = scmp.lt.s32.totalorder %s20_s16, %s20_s16 }
   0x8   :  { %p1087_p3 = scmp.ne.s32.totalorder %s20_s16, %s1086_s24  ;;  %p1092_p5 = scmp.lt.s32.totalorder %s1086_s24, %s1086_s24 }
   0xa   :  { %p1093_p6 = por %p1092_p5, %p1091_p4 }
   0xc   :  { %p1094_p7 = pnand %p1093_p6, %p1087_p3 }
   0xe   :  { %1097 = shalt.err (!%p1094_p7)
}
   0xf   :  { %s1101_s25 = smov 128   ;;  %s1102_s26 = smov 8  }
  0x10   :  { %25 = dma.hbm_to_vmem [thread:$0]  %s1241_s2, 3072, %s20_s16, [#allocation5], %s1101_s25, %s1101_s25, %s1102_s26  }
  0x11   :  { %1098 = dma.done.wait [#allocation5], 3072  }
  0x12   :  { %1099 = vsyncadd [#allocation5], 4294964224  ;;  %v1103_v0 = vmov 0   ;;  %v64_v1 = vld [vmem:[%s1239_s0 + $0x1] sm:$0xff]  ;;  %v65_v3 = vld [vmem:[%s1239_s0 + $0x9] sm:$0xff]  ;;  %vm151_vm0 = vcmask 261120  }
  0x13   :  { %1075 = vset.pattern.permute.xlu1 %v1103_v0  ;;  %1074 = vset.pattern.permute.xlu0 %v1103_v0  ;;  %v31_v2 = vld [vmem:[%s1239_s0] sm:$0xff]  ;;  %v32_v4 = vld [vmem:[%s1239_s0 + $0x8] sm:$0xff]  ;;  %v66_v5 = vld [vmem:[%s1239_s0 + $0x11] sm:$0xff]  ;;  %vm155_vm1 = vcmask 259072   ;;  %vm494_vm2 = vcmask 257024   ;;  %vm832_vm3 = vcmask 254976  }
  0x14   :  { %71 = vperm.xlu1 %1075, %v64_v1   ;;  %38 = vperm.xlu0 %1074, %v31_v2   ;;  %v33_v6 = vld [vmem:[%s1239_s0 + $0x10] sm:$0xff]  ;;  %v101_v8 = vld [vmem:[%s1239_s0 + $0x2] sm:$0xff]  ;;  %v34_v9 = vld [vmem:[%s1239_s0 + $0x18] sm:$0x3f] }
  0x15   :  { %v102_v7 = vld [vmem:[%s1239_s0 + $0xa] sm:$0xff]  ;;  %v103_v10 = vld [vmem:[%s1239_s0 + $0x12] sm:$0xff]  ;;  %v104_v11 = vld [vmem:[%s1239_s0 + $0x1a] sm:$0x3f] }
  0x16   :  { %v67_v12 = vld [vmem:[%s1239_s0 + $0x19] sm:$0x3f]  ;;  %v170_v13 = vld [vmem:[#allocation4 + $0x20] sm:$0xff]  ;;  %v171_v14 = vld [vmem:[#allocation4 + $0x28] sm:$0xff] }
  0x17   :  { %v1006_v15 = vpack.c.bf16 %v171_v14, %v170_v13  ;;  %v172_v16 = vld [vmem:[#allocation4 + $0x30] sm:$0xff]  ;;  %v173_v17 = vld [vmem:[#allocation4 + $0x38] sm:$0xff]  ;;  %v161_v19 = vld [vmem:[#allocation4] sm:$0xff] }
  0x18   :  { %76 = vperm.xlu1 %1075, %v65_v3   ;;  %43 = vperm.xlu0 %1074, %v32_v4   ;;  %v1010_v18 = vpack.c.bf16 %v173_v17, %v172_v16  ;;  %v162_v20 = vld [vmem:[#allocation4 + $0x8] sm:$0xff]  ;;  %v843_v26 = vld [vmem:[%s1240_s1 + $0x1] ss:$0 sm:$0xff]  ;;  %v842_v27 = vld [vmem:[%s1240_s1] ss:$0 sm:$0xff] }
  0x19   :  { %1007 = vmatprep.subr.bf16.mxu0 %v1006_v15  ;;  %v1014_v21 = vpack.c.bf16 %v162_v20, %v161_v19  ;;  %v844_v34 = vld [vmem:[%s1240_s1 + $0x2] ss:$0 sm:$0xff]  ;;  %v845_v43 = vld [vmem:[%s1242_s3] ss:$0 sm:$0xff]  ;;  %v163_v2 = vld [vmem:[#allocation4 + $0x10] sm:$0xff] }
  0x1a   :  { %1009 = vmatpush3.bf16.msra.mxu0 %v1006_v15  ;;  %v164_v3 = vld [vmem:[#allocation4 + $0x18] sm:$0xff] }
  0x1b   :  { %1011 = vmatprep.subr.bf16.mxu0 %v1010_v18  ;;  %v376_v13 = vld [vmem:[#allocation4 + $0x58] sm:$0xff] }
  0x1c   :  { %81 = vperm.xlu1 %1075, %v66_v5   ;;  %48 = vperm.xlu0 %1074, %v33_v6   ;;  %v1018_v5 = vpack.c.bf16 %v164_v3, %v163_v2  ;;  %v871_v2 = vld [vmem:[%s1242_s3 + $0x2] ss:$0 sm:$0xff] }
  0x1e   :  { %1013 = vmatpush3.bf16.msra.mxu0 %v1010_v18 }
  0x1f   :  { %1015 = vmatprep.subr.bf16.mxu0 %v1014_v21 }
  0x20   :  { %113 = vperm.xlu1 %1075, %v102_v7   ;;  %108 = vperm.xlu0 %1074, %v101_v8   ;;  %v373_v7 = vld [vmem:[#allocation4 + $0x40] sm:$0xff]  ;;  %v374_v8 = vld [vmem:[#allocation4 + $0x48] sm:$0xff] }
  0x24   :  { %53 = vperm.xlu1 %1075, %v34_v9   ;;  %118 = vperm.xlu0 %1074, %v103_v10   ;;  %v1022_v9 = vpack.c.bf16 %v374_v8, %v373_v7 }
  0x28   :  { %123 = vperm.xlu1 %1075, %v104_v11   ;;  %86 = vperm.xlu0 %1074, %v67_v12   ;;  %v375_v12 = vld [vmem:[#allocation4 + $0x50] sm:$0xff] }
  0x29   :  { %v1026_v15 = vpack.c.bf16 %v376_v13, %v375_v12 }
  0x93   :  { %v72_v22 = vpop.permute.xlu1 %71  ;;  %v39_v23 = vpop.permute.xlu0 %38 }
  0x94   :  { %v93_v28 = vmul.f32 %v843_v26, %v72_v22  ;;  %v60_v29 = vmul.f32 %v842_v27, %v39_v23  ;;  %v510_v23 = vld [vmem:[#allocation4 + $0x80] sm:$0xff] }
  0x96   :  { %v97_v35 = vadd.f32 %v93_v28, %v60_v29  ;;  %v501_v29 = vld [vmem:[#allocation4 + $0x60] sm:$0xff] }
  0x97   :  { %v77_v24 = vpop.permute.xlu1 %76  ;;  %v44_v25 = vpop.permute.xlu0 %43 }
  0x98   :  { %v94_v30 = vmul.f32 %v843_v26, %v77_v24  ;;  %v61_v31 = vmul.f32 %v842_v27, %v44_v25  ;;  %v511_v24 = vld [vmem:[#allocation4 + $0x88] sm:$0xff] }
  0x99   :  { %v1030_v25 = vpack.c.bf16 %v511_v24, %v510_v23 }
  0x9a   :  { %v98_v36 = vadd.f32 %v94_v30, %v61_v31  ;;  %v502_v30 = vld [vmem:[#allocation4 + $0x68] sm:$0xff] }
  0x9b   :  { %v82_v32 = vpop.permute.xlu1 %81  ;;  %v49_v33 = vpop.permute.xlu0 %48  ;;  %1031 = vmatprep.subr.bf16.mxu1 %v1030_v25  ;;  %v1038_v31 = vpack.c.bf16 %v502_v30, %v501_v29 }
  0x9c   :  { %v95_v39 = vmul.f32 %v843_v26, %v82_v32  ;;  %v62_v40 = vmul.f32 %v842_v27, %v49_v33  ;;  %1033 = vmatpush3.bf16.msra.mxu1 %v1030_v25  ;;  %v858_v32 = vld [vmem:[%s1242_s3 + $0x1] ss:$0 sm:$0xff] }
  0x9e   :  { %v99_v48 = vadd.f32 %v95_v39, %v62_v40 }
  0x9f   :  { %v114_v37 = vpop.permute.xlu1 %113  ;;  %v109_v38 = vpop.permute.xlu0 %108 }
  0xa0   :  { %v131_v41 = vmul.f32 %v844_v34, %v114_v37  ;;  %v130_v42 = vmul.f32 %v844_v34, %v109_v38 }
  0xa2   :  { %v135_v44 = vadd.f32 %v131_v41, %v98_v36  ;;  %v134_v45 = vadd.f32 %v130_v42, %v97_v35 }
  0xa3   :  { %v54_v46 = vpop.permute.xlu1 %53  ;;  %v119_v47 = vpop.permute.xlu0 %118 }
  0xa4   :  { %v144_v49 = vadd.f32 %v845_v43, %v135_v44  ;;  %v143_v50 = vadd.f32 %v845_v43, %v134_v45  ;;  %v132_v51 = vmul.f32 %v844_v34, %v119_v47  ;;  %v63_v57 = vmul.f32 %v842_v27, %v54_v46  ;;  %v513_v27 = vld [vmem:[#allocation4 + $0x98] sm:$0xff]  ;;  %v503_v46 = vld [vmem:[#allocation4 + $0x70] sm:$0xff] }
  0xa5   :  { %v504_v47 = vld [vmem:[#allocation4 + $0x78] sm:$0xff] }
  0xa6   :  { %v148_v52 = vmax.f32 %v144_v49, 0.0  ;;  %v147_v53 = vmax.f32 %v143_v50, 0.0  ;;  %v136_v54 = vadd.f32 %v132_v51, %v99_v48  ;;  %v1042_v48 = vpack.c.bf16 %v504_v47, %v503_v46  ;;  %v713_v49 = vld [vmem:[#allocation4 + $0xa0] sm:$0xff] }
  0xa7   :  { %v124_v55 = vpop.permute.xlu1 %123  ;;  %v87_v56 = vpop.permute.xlu0 %86 }
  0xa8   :  { %153 = vst.msk [vmem:[#allocation2 + $0x8] sm:$0xff] %vm151_vm0, %v148_v52  ;;  %152 = vst.msk [vmem:[#allocation2] sm:$0xff] %vm151_vm0, %v147_v53  ;;  %v145_v58 = vadd.f32 %v845_v43, %v136_v54  ;;  %v96_v59 = vmul.f32 %v843_v26, %v87_v56  ;;  %v133_v61 = vmul.f32 %v844_v34, %v124_v55  ;;  %v512_v26 = vld [vmem:[#allocation4 + $0x90] sm:$0xff]  ;;  %v714_v52 = vld [vmem:[#allocation4 + $0xa8] sm:$0xff] }
  0xa9   :  { %v1034_v28 = vpack.c.bf16 %v513_v27, %v512_v26  ;;  %v1046_v53 = vpack.c.bf16 %v714_v52, %v713_v49  ;;  %v715_v55 = vld [vmem:[#allocation4 + $0xb0] sm:$0xff]  ;;  %v716_v56 = vld [vmem:[#allocation4 + $0xb8] sm:$0xff] }
  0xaa   :  { %v149_v60 = vmax.f32 %v145_v58, 0.0  ;;  %v100_v62 = vadd.f32 %v96_v59, %v63_v57  ;;  %v1050_v58 = vpack.c.bf16 %v716_v56, %v715_v55 }
  0xab   :  { %1035 = vmatprep.subr.bf16.mxu1 %v1034_v28 }
  0xac   :  { %154 = vst.msk [vmem:[#allocation2 + $0x10] sm:$0xff] %vm151_vm0, %v149_v60  ;;  %v137_v63 = vadd.f32 %v133_v61, %v100_v62  ;;  %1037 = vmatpush3.bf16.msra.mxu1 %v1034_v28 }
  0xad   :  { %1039 = vmatprep.subr.bf16.mxu1 %v1038_v31 }
  0xae   :  { %v146_v0 = vadd.f32 %v845_v43, %v137_v63 }
  0xaf   :  { %v165_v1 = vld [vmem:[#allocation2 + $0x1] sm:$0xff] }
  0xb0   :  { %v150_v4 = vmax.f32 %v146_v0, 0.0  ;;  %930 = vmatprep.mubr.msk.f32.mxu0 %vm151_vm0, %v165_v1  ;;  %v157_v14 = vld [vmem:[#allocation2] sm:$0xff]  ;;  %v158_v16 = vld [vmem:[#allocation2 + $0x8] sm:$0xff] }
  0xb1   :  { %v368_v19 = vld [vmem:[#allocation2 + $0x2] sm:$0xff] }
  0xb2   :  { %156 = vst.msk [vmem:[#allocation2 + $0x18] sm:$0x3f] %vm155_vm1, %v150_v4 }
  0xb3   :  { %v166_v6 = vld [vmem:[#allocation2 + $0x9] sm:$0xff] }
  0xb4   :  { %931 = vmatmul.mubr.msk.f32.vlgmr.msra.gmra.mrb[0].mxu0 %vm151_vm0, %v166_v6  ;;  %v159_v17 = vld [vmem:[#allocation2 + $0x10] sm:$0xff] }
  0xb5   :  { %1017 = vmatpush3.bf16.msra.mxu0 %v1014_v21  ;;  %v369_v20 = vld [vmem:[#allocation2 + $0xa] sm:$0xff] }
  0xb6   :  { %1019 = vmatprep.subr.bf16.mxu0 %v1018_v5 }
  0xb9   :  { %v167_v10 = vld [vmem:[#allocation2 + $0x11] sm:$0xff]  ;;  %v168_v11 = vld [vmem:[#allocation2 + $0x19] sm:$0xf]  ;;  %1021 = vmatpush3.bf16.msra.mxu0 %v1018_v5 }
  0xba   :  { %933 = vmatprep.mubr.msk.f32.mxu0 %vm151_vm0, %v167_v10  ;;  %1023 = vmatprep.subr.bf16.mxu0 %v1022_v9  ;;  %v160_v18 = vld [vmem:[#allocation2 + $0x18] sm:$0xf] }
  0xbb   :  { %934 = vmatmul.mubr.msk.f32.gmra.mrb[2].mxu0 %vm151_vm0, %v168_v11  ;;  %v370_v21 = vld [vmem:[#allocation2 + $0x12] sm:$0xff]  ;;  %v371_v22 = vld [vmem:[#allocation2 + $0x1a] sm:$0xf] }
  0xbc   :  { %944 = vmatprep.mubr.msk.f32.mxu0 %vm151_vm0, %v157_v14 }
  0xbf   :  { %945 = vmatmul.mubr.msk.f32.vlgmr.msra.gmra.mrb[0].mxu0 %vm151_vm0, %v158_v16 }
  0xc0   :  { %1025 = vmatpush3.bf16.msra.mxu0 %v1022_v9  ;;  %947 = vmatprep.mubr.msk.f32.mxu0 %vm151_vm0, %v159_v17 }
  0xc1   :  { %1027 = vmatprep.subr.bf16.mxu0 %v1026_v15 }
  0xc3   :  { %948 = vmatmul.mubr.msk.f32.gmra.mrb[2].mxu0 %vm151_vm0, %v160_v18 }
  0xc4   :  { %1029 = vmatpush3.bf16.msra.mxu0 %v1026_v15  ;;  %958 = vmatprep.mubr.msk.f32.mxu0 %vm151_vm0, %v368_v19 }
  0xc7   :  { %959 = vmatmul.mubr.msk.f32.vlgmr.msra.gmra.mrb[0].mxu0 %vm151_vm0, %v369_v20 }
  0xc8   :  { %961 = vmatprep.mubr.msk.f32.mxu0 %vm151_vm0, %v370_v21 }
  0xcb   :  { %962 = vmatmul.mubr.msk.f32.gmra.mrb[2].mxu0 %vm151_vm0, %v371_v22 }
 0x19a   :  { %v960_v33 = vpop.f32.mrb[0].mxu0 }
 0x19b   :  { %v484_v34 = vadd.f32 %v960_v33, %v858_v32  ;;  %v455_v35 = vpop.f32.mrb[1].mxu0 }
 0x19c   :  { %v483_v36 = vadd.f32 %v858_v32, %v455_v35 }
 0x19d   :  { %v488_v37 = vmax.f32 %v484_v34, 0.0 }
 0x19e   :  { %v487_v38 = vmax.f32 %v483_v36, 0.0  ;;  %v963_v39 = vpop.f32.mrb[2].mxu0 }
 0x19f   :  { %492 = vst.msk [vmem:[#allocation3 + $0x8] sm:$0xff] %vm151_vm0, %v488_v37  ;;  %v486_v40 = vadd.f32 %v963_v39, %v858_v32  ;;  %v465_v41 = vpop.f32.mrb[3].mxu0 }
 0x1a0   :  { %491 = vst.msk [vmem:[#allocation3] sm:$0xff] %vm151_vm0, %v487_v38  ;;  %v485_v42 = vadd.f32 %v858_v32, %v465_v41 }
 0x1a1   :  { %v490_v43 = vmax.f32 %v486_v40, 0.0 }
 0x1a2   :  { %v489_v44 = vmax.f32 %v485_v42, 0.0 }
 0x1a3   :  { %495 = vst.msk [vmem:[#allocation3 + $0x18] sm:$0xf] %vm494_vm2, %v490_v43 }
 0x1a4   :  { %493 = vst.msk [vmem:[#allocation3 + $0x10] sm:$0xff] %vm151_vm0, %v489_v44 }
 0x1a6   :  { %v497_v59 = vld [vmem:[#allocation3 + $0x8] sm:$0xff] }
 0x1a7   :  { %v505_v45 = vld [vmem:[#allocation3 + $0x1] sm:$0xff] }
 0x1a8   :  { %972 = vmatprep.mubr.msk.f32.mxu1 %vm151_vm0, %v505_v45  ;;  %v496_v57 = vld [vmem:[#allocation3] sm:$0xff] }
 0x1a9   :  { %v708_v62 = vld [vmem:[#allocation3 + $0x2] sm:$0xff] }
 0x1aa   :  { %v508_v54 = vld [vmem:[#allocation3 + $0x19] sm:$0x3] }
 0x1ab   :  { %v506_v50 = vld [vmem:[#allocation3 + $0x9] sm:$0xff]  ;;  %v507_v51 = vld [vmem:[#allocation3 + $0x11] sm:$0xff]  ;;  %v711_v1 = vld [vmem:[#allocation3 + $0x1a] sm:$0x3] }
 0x1ac   :  { %973 = vmatmul.mubr.msk.f32.vlgmr.msra.gmra.mrb[0].mxu1 %vm151_vm0, %v506_v50  ;;  %v498_v60 = vld [vmem:[#allocation3 + $0x10] sm:$0xff]  ;;  %v499_v61 = vld [vmem:[#allocation3 + $0x18] sm:$0x3] }
 0x1ad   :  { %1041 = vmatpush3.bf16.msra.mxu1 %v1038_v31  ;;  %975 = vmatprep.mubr.msk.f32.mxu1 %vm151_vm0, %v507_v51  ;;  %v709_v63 = vld [vmem:[#allocation3 + $0xa] sm:$0xff]  ;;  %v710_v0 = vld [vmem:[#allocation3 + $0x12] sm:$0xff] }
 0x1ae   :  { %1043 = vmatprep.subr.bf16.mxu1 %v1042_v48 }
 0x1b0   :  { %976 = vmatmul.mubr.msk.f32.gmra.mrb[2].mxu1 %vm151_vm0, %v508_v54 }
 0x1b1   :  { %1045 = vmatpush3.bf16.msra.mxu1 %v1042_v48  ;;  %986 = vmatprep.mubr.msk.f32.mxu1 %vm151_vm0, %v496_v57 }
 0x1b2   :  { %1047 = vmatprep.subr.bf16.mxu1 %v1046_v53 }
 0x1b4   :  { %987 = vmatmul.mubr.msk.f32.vlgmr.msra.gmra.mrb[0].mxu1 %vm151_vm0, %v497_v59 }
 0x1b5   :  { %1049 = vmatpush3.bf16.msra.mxu1 %v1046_v53  ;;  %989 = vmatprep.mubr.msk.f32.mxu1 %vm151_vm0, %v498_v60 }
 0x1b6   :  { %1051 = vmatprep.subr.bf16.mxu1 %v1050_v58 }
 0x1b8   :  { %990 = vmatmul.mubr.msk.f32.gmra.mrb[2].mxu1 %vm151_vm0, %v499_v61 }
 0x1b9   :  { %1053 = vmatpush3.bf16.msra.mxu1 %v1050_v58  ;;  %1000 = vmatprep.mubr.msk.f32.mxu1 %vm151_vm0, %v708_v62 }
 0x1bc   :  { %1001 = vmatmul.mubr.msk.f32.vlgmr.msra.gmra.mrb[0].mxu1 %vm151_vm0, %v709_v63 }
 0x1bd   :  { %1003 = vmatprep.mubr.msk.f32.mxu1 %vm151_vm0, %v710_v0 }
 0x1c0   :  { %1004 = vmatmul.mubr.msk.f32.gmra.mrb[2].mxu1 %vm151_vm0, %v711_v1 }
 0x28f   :  { %v1002_v3 = vpop.f32.mrb[0].mxu1 }
 0x290   :  { %v824_v4 = vadd.f32 %v1002_v3, %v871_v2  ;;  %v795_v5 = vpop.f32.mrb[1].mxu1 }
 0x291   :  { %v823_v6 = vadd.f32 %v871_v2, %v795_v5 }
 0x292   :  { %v828_v7 = vmax.f32 %v824_v4, 0.0 }
 0x293   :  { %v827_v8 = vmax.f32 %v823_v6, 0.0  ;;  %v1005_v9 = vpop.f32.mrb[2].mxu1 }
 0x294   :  { %833 = vst.msk [vmem:[%s1243_s4 + $0x8] sm:$0x3] %vm832_vm3, %v828_v7  ;;  %v826_v10 = vadd.f32 %v1005_v9, %v871_v2  ;;  %v805_v11 = vpop.f32.mrb[3].mxu1 }
 0x295   :  { %831 = vst.msk [vmem:[%s1243_s4] sm:$0xff] %vm151_vm0, %v827_v8  ;;  %v825_v12 = vadd.f32 %v871_v2, %v805_v11 }
 0x296   :  { %v830_v13 = vmax.f32 %v826_v10, 0.0 }
 0x297   :  { %v829_v14 = vmax.f32 %v825_v12, 0.0 }
 0x298   :  { %873 = vst.msk [vmem:[%s1243_s4 + $0x18] sm:$0x3] %vm832_vm3, %v830_v13 }
 0x299   :  { %872 = vst.msk [vmem:[%s1243_s4 + $0x10] sm:$0xff] %vm151_vm0, %v829_v14 }
 0x29a   :  { %841 = vsyncpa [#allocation5], 1 }

</bundles_post_ra>
